<compile_context>
chip_gen: v7x
topology: tpu7x:2x2x1
jax: 0.10.0
libtpu: 0.0.40
codegen_flags: <defaults>
</compile_context>

<pallas_src>
import jax
import jax.numpy as jnp
from jax.experimental import pallas as pl
from jax.experimental.pallas import tpu as pltpu


def discriminator_kernel(xT_ref, w1_ref, b1_ref, w2r_ref, b2_ref, o_ref):
    # xT_ref : (D_in, TB)   input slab, batch on the lane axis
    # w1_ref : (H, D_in)    PyTorch-native Linear weight layout
    # b1_ref : (H, 1)
    # w2r_ref: (1, H)       second-layer weight as a row (PyTorch-native)
    # b2_ref : (1, 1)       scalar in SMEM
    # o_ref  : (1, TB)      lane-dense output slab
    xT = xT_ref[...]
    w1 = w1_ref[...]
    if w1.shape[1] == 1:
        # K=1 contraction: pure VPU broadcast multiply, no MXU pass needed.
        pre = w1 * xT                                        # (H, TB)
    else:
        # General input_dim fallback (not hit for this module's default).
        pre = jnp.dot(w1, xT, preferred_element_type=jnp.float32)
    h = jnp.tanh(pre + b1_ref[...])                          # EUP tanh, (H, TB)
    # Layer 2 on the (otherwise idle) MXU: (1,H) @ (H,TB) -> (1,TB).
    z = jnp.dot(w2r_ref[...], h, preferred_element_type=jnp.float32)
    z = z + b2_ref[0, 0]                                     # scalar add from SMEM
    o_ref[...] = jax.nn.sigmoid(z).astype(o_ref.dtype)


def _round_up(v, m):
    return pl.cdiv(v, m) * m


def discriminator_forward(x, w1, b1, w2, b2, *, block_b=8192):
    """Forward pass of the GAN Discriminator.

    x : (B, input_dim) f32
    w1: (hidden_dim, input_dim) f32   (PyTorch nn.Linear layout)
    b1: (hidden_dim,) f32
    w2: (1, hidden_dim) f32
    b2: (1,) f32
    returns (B, 1) f32
    """
    B, d_in = x.shape
    H = w1.shape[0]
    LANE = 128

    # --- batch tile choice -------------------------------------------------
    # Lane-aligned tile, capped by block_b; for batches bigger than one lane
    # group aim for >=2 grid steps so the "parallel" axis can span both TCs.
    block_b = max(LANE, _round_up(block_b, LANE))
    if B <= LANE:
        tb = LANE
    else:
        tb = min(block_b, _round_up(pl.cdiv(B, 2), LANE))
    b_pad = _round_up(B, tb)
    grid = (b_pad // tb,)

    # --- layout plumbing (wrapper side): batch goes to the lane axis --------
    xT = x.astype(jnp.float32).T                              # (D_in, B)
    if B < tb:
        # Tiny batch: negligible pad to a single full lane-aligned tile.
        xT = jnp.pad(xT, ((0, 0), (0, tb - B)))
    # Large batches are NOT padded: the final partial block is handled by
    # Pallas masked loads/stores (no reduction over batch => tail is harmless).

    w1f = w1.astype(jnp.float32)
    b1c = b1.reshape(H, 1).astype(jnp.float32)
    w2r = w2.reshape(1, H).astype(jnp.float32)
    b2s = b2.reshape(1, 1).astype(jnp.float32)                # scalar for SMEM

    out = pl.pallas_call(
        discriminator_kernel,
        out_shape=jax.ShapeDtypeStruct((1, b_pad), jnp.float32),
        grid=grid,
        in_specs=[
            pl.BlockSpec((d_in, tb), lambda i: (0, i)),       # x^T, batch-blocked (pipelined)
            pl.BlockSpec((H, d_in), lambda i: (0, 0)),        # w1, VMEM-resident
            pl.BlockSpec((H, 1), lambda i: (0, 0)),           # b1, VMEM-resident
            pl.BlockSpec((1, H), lambda i: (0, 0)),           # w2 row, VMEM-resident
            pl.BlockSpec(memory_space=pltpu.MemorySpace.SMEM),  # b2 scalar in SMEM
        ],
        out_specs=pl.BlockSpec((1, tb), lambda i: (0, i)),    # lane-dense output slab
        compiler_params=pltpu.CompilerParams(
            dimension_semantics=("parallel",),                # megacore-shardable batch axis
            vmem_limit_bytes=32 * 1024 * 1024,                # safe ceiling on all gens
        ),
    )(xT, w1f, b1c, w2r, b2s)

    return out[0, :B].reshape(B, 1)


def init_params(key, input_dim=1, hidden_dim=128):
    """Deterministic PyTorch-style init: U(-1/sqrt(fan_in), +1/sqrt(fan_in)).
    Weights kept in PyTorch-native (out_features, in_features) layout."""
    k1, k2, k3, k4 = jax.random.split(key, 4)
    bound1 = 1.0 / jnp.sqrt(jnp.float32(input_dim))
    bound2 = 1.0 / jnp.sqrt(jnp.float32(hidden_dim))
    w1 = jax.random.uniform(k1, (hidden_dim, input_dim), jnp.float32, -bound1, bound1)
    b1 = jax.random.uniform(k2, (hidden_dim,), jnp.float32, -bound1, bound1)
    w2 = jax.random.uniform(k3, (1, hidden_dim), jnp.float32, -bound2, bound2)
    b2 = jax.random.uniform(k4, (1,), jnp.float32, -bound2, bound2)
    return w1, b1, w2, b2


def ref_forward(x, w1, b1, w2, b2):
    # Pure-JAX reference of the same PyTorch forward.
    h = jnp.tanh(x @ w1.T + b1)
    return jax.nn.sigmoid(h @ w2.T + b2)


if __name__ == "__main__":
    key = jax.random.PRNGKey(0)
    k_x, k_x2, k_p = jax.random.split(key, 3)

    input_dim, hidden_dim = 1, 128
    w1, b1, w2, b2 = init_params(k_p, input_dim, hidden_dim)

    # Tolerance note: layer 2 runs on the MXU; depending on generation/default
    # dot precision the f32 contraction may be evaluated with bf16 passes, so
    # the check uses a 2e-3 bound (still catches any structural/layout bug;
    # sigmoid outputs lie in (0, 1)).
    ATOL = 2e-3

    # Small batch: single lane-aligned tile (padded inside the wrapper).
    batch = 8
    x = jax.random.normal(k_x, (batch, input_dim), jnp.float32)
    out = jax.block_until_ready(discriminator_forward(x, w1, b1, w2, b2))
    ref = ref_forward(x, w1, b1, w2, b2)
    assert out.shape == (batch, 1)
    assert jnp.allclose(out, ref, atol=ATOL, rtol=ATOL)

    # Larger, unaligned batch: exercises the >=2-step batch grid, pipelining,
    # and the masked partial final block (no wrapper-side padding).
    batch2 = 1000
    x2 = jax.random.normal(k_x2, (batch2, input_dim), jnp.float32)
    out2 = jax.block_until_ready(discriminator_forward(x2, w1, b1, w2, b2))
    ref2 = ref_forward(x2, w1, b1, w2, b2)
    assert out2.shape == (batch2, 1)
    assert jnp.allclose(out2, ref2, atol=ATOL, rtol=ATOL)

    print("KERNEL_OK")
</pallas_src>

<mosaic_0001>
module attributes {stable_mosaic.version = 11 : i64} {
  func.func @discriminator_kernel(%arg0: i32, %arg1: memref<1x128xf32, #tpu.memory_space<vmem>>, %arg2: memref<128x1xf32, #tpu.memory_space<vmem>>, %arg3: memref<128x1xf32, #tpu.memory_space<vmem>>, %arg4: memref<1x128xf32, #tpu.memory_space<vmem>>, %arg5: memref<1x1xf32, #tpu.memory_space<smem>>, %arg6: memref<1x128xf32, #tpu.memory_space<vmem>>) attributes {dimension_semantics = [#tpu.dimension_semantics<parallel>], iteration_bounds = array<i64: 1>, scalar_prefetch = 0 : i64, scratch_operands = 0 : i64, tpu.core_type = #tpu.core_type<tc>, window_params = [{transform_indices = @transform_0, window_bounds = array<i64: 1, 128>}, {pipeline_mode = #tpu.pipeline_mode<synchronous>, transform_indices = @transform_1, window_bounds = array<i64: 128, 1>}, {pipeline_mode = #tpu.pipeline_mode<synchronous>, transform_indices = @transform_2, window_bounds = array<i64: 128, 1>}, {pipeline_mode = #tpu.pipeline_mode<synchronous>, transform_indices = @transform_3, window_bounds = array<i64: 1, 128>}, {transform_indices = @transform_4, window_bounds = array<i64: 1, 1>}, {transform_indices = @transform_5, window_bounds = array<i64: 1, 128>}]} {
    %c0 = arith.constant 0 : index
    %c0_0 = arith.constant 0 : index
    %0 = vector.load %arg1[%c0, %c0_0] : memref<1x128xf32, #tpu.memory_space<vmem>>, vector<1x128xf32>
    %c0_1 = arith.constant 0 : index
    %c0_2 = arith.constant 0 : index
    %1 = vector.load %arg2[%c0_1, %c0_2] : memref<128x1xf32, #tpu.memory_space<vmem>>, vector<128x1xf32>
    %2 = vector.broadcast %1 : vector<128x1xf32> to vector<128x128xf32>
    %3 = vector.broadcast %0 : vector<1x128xf32> to vector<128x128xf32>
    %4 = arith.mulf %2, %3 : vector<128x128xf32>
    %c0_3 = arith.constant 0 : index
    %c0_4 = arith.constant 0 : index
    %5 = vector.load %arg3[%c0_3, %c0_4] : memref<128x1xf32, #tpu.memory_space<vmem>>, vector<128x1xf32>
    %6 = vector.broadcast %5 : vector<128x1xf32> to vector<128x128xf32>
    %7 = arith.addf %4, %6 : vector<128x128xf32>
    %8 = math.tanh %7 : vector<128x128xf32>
    %c0_5 = arith.constant 0 : index
    %c0_6 = arith.constant 0 : index
    %9 = vector.load %arg4[%c0_5, %c0_6] : memref<1x128xf32, #tpu.memory_space<vmem>>, vector<1x128xf32>
    %cst = arith.constant dense<0.000000e+00> : vector<1x128xf32>
    %10 = tpu.matmul %9, %8, %cst {dimension_numbers = #tpu.dot_dimension_numbers<[1], [0], [0], [1], [0, 0, 1, 1], [], []>} : vector<1x128xf32>, vector<128x128xf32>, vector<1x128xf32> -> vector<1x128xf32>
    %c0_7 = arith.constant 0 : index
    %c0_8 = arith.constant 0 : index
    %11 = memref.load %arg5[%c0_7, %c0_8] : memref<1x1xf32, #tpu.memory_space<smem>>
    %12 = vector.broadcast %11 : f32 to vector<1x128xf32>
    %13 = arith.addf %10, %12 : vector<1x128xf32>
    %14 = arith.negf %13 : vector<1x128xf32>
    %15 = math.exp %14 : vector<1x128xf32>
    %cst_9 = arith.constant 1.000000e+00 : f32
    %16 = vector.broadcast %cst_9 : f32 to vector<1x128xf32>
    %17 = arith.addf %16, %15 : vector<1x128xf32>
    %18 = arith.divf %16, %17 : vector<1x128xf32>
    %c0_10 = arith.constant 0 : index
    %c0_11 = arith.constant 0 : index
    %19 = vector.load %arg6[%c0_10, %c0_11] : memref<1x128xf32, #tpu.memory_space<vmem>>, vector<1x128xf32>
    tpu.vector_store %arg6[%c0_10, %c0_11], %18 {strides = array<i32>} : memref<1x128xf32, #tpu.memory_space<vmem>>, vector<1x128xf32>,
    return
  }
  func.func @transform_0(%arg0: i32) -> (i32, i32) {
    %c0_i32 = arith.constant 0 : i32
    %c0_i32_0 = arith.constant 0 : i32
    return %c0_i32, %arg0 : i32, i32
  }
  func.func @transform_1(%arg0: i32) -> (i32, i32) {
    %c0_i32 = arith.constant 0 : i32
    %c0_i32_0 = arith.constant 0 : i32
    %c0_i32_1 = arith.constant 0 : i32
    return %c0_i32, %c0_i32_0 : i32, i32
  }
  func.func @transform_2(%arg0: i32) -> (i32, i32) {
    %c0_i32 = arith.constant 0 : i32
    %c0_i32_0 = arith.constant 0 : i32
    %c0_i32_1 = arith.constant 0 : i32
    return %c0_i32, %c0_i32_0 : i32, i32
  }
  func.func @transform_3(%arg0: i32) -> (i32, i32) {
    %c0_i32 = arith.constant 0 : i32
    %c0_i32_0 = arith.constant 0 : i32
    %c0_i32_1 = arith.constant 0 : i32
    return %c0_i32, %c0_i32_0 : i32, i32
  }
  func.func @transform_4(%arg0: i32) -> (i32, i32) {
    %c0_i32 = arith.constant 0 : i32
    %c0_i32_0 = arith.constant 0 : i32
    %c0_i32_1 = arith.constant 0 : i32
    return %c0_i32, %c0_i32_0 : i32, i32
  }
  func.func @transform_5(%arg0: i32) -> (i32, i32) {
    %c0_i32 = arith.constant 0 : i32
    %c0_i32_0 = arith.constant 0 : i32
    return %c0_i32, %arg0 : i32, i32
  }
}

</mosaic_0001>

<bundles_post_ra>
// kernel: tpu_custom_call.1
= control target key start
LH: loop header
LB: loop body
LE: loop exit
PB: predicated region body
PF: predicated region fallthrough
CT: control target
= control target key end

     0   :  { %v508_v2 = vmov 0   ;;  %s686_s0 = inlined_call_operand.vmem [shape: f32[1,128], index: 0, kind: input, shape index: {}]   ;;  %s687_s1 = inlined_call_operand.vmem [shape: f32[128,1], index: 1, kind: input, shape index: {}]   ;;  %s688_s2 = inlined_call_operand.vmem [shape: f32[128,1], index: 2, kind: input, shape index: {}]   ;;  %s689_s3 = inlined_call_operand.vmem [shape: f32[1,128], index: 3, kind: input, shape index: {}]   ;;  %s690_s4 = inlined_call_operand.<no memory space> [shape: f32[1,1], index: 4, kind: input, shape index: {}]   ;;  %s691_s5 = inlined_call_operand.hbm [shape: f32[1,128], index: 5, kind: output, shape index: {}]  }
   0x1   :  { %v141_v0 = vld [vmem:[%s688_s2] sm:$0xff]  ;;  %447 = vset.pattern.permute.xlu1 %v508_v2  ;;  %446 = vset.pattern.permute.xlu0 %v508_v2  ;;  %v142_v3 = vld [vmem:[%s688_s2 + $0x8] sm:$0xff]  ;;  %v26_v5 = vld [vmem:[%s687_s1 + $0x18] sm:$0xff] }
   0x2   :  { %v23_v1 = vld [vmem:[%s687_s1] sm:$0xff]  ;;  %159 = vperm.xlu1 %447, %v141_v0   ;;  %v24_v4 = vld [vmem:[%s687_s1 + $0x8] sm:$0xff]  ;;  %v25_v6 = vld [vmem:[%s687_s1 + $0x10] sm:$0xff] }
   0x3   :  { %41 = vperm.xlu0 %446, %v23_v1   ;;  %v144_v7 = vld [vmem:[%s688_s2 + $0x18] sm:$0xff]  ;;  %v143_v8 = vld [vmem:[%s688_s2 + $0x10] sm:$0xff] }
   0x6   :  { %164 = vperm.xlu1 %447, %v142_v3  }
   0x7   :  { %46 = vperm.xlu0 %446, %v24_v4  }
   0xa   :  { %56 = vperm.xlu1 %447, %v26_v5  }
   0xb   :  { %51 = vperm.xlu0 %446, %v25_v6  }
   0xc   :  { %11 = vsyncpa [#allocation4], 0  ;;  %v28_v9 = vld [vmem:[%s687_s1 + $0x28] sm:$0xff]  ;;  %v27_v10 = vld [vmem:[%s687_s1 + $0x20] sm:$0xff]  ;;  %v509_v15 = vmov 0.0|0.0   ;;  %vm510_vm0 = vmmov 0  }
   0xd   :  { %v146_v11 = vld [vmem:[%s688_s2 + $0x28] sm:$0xff]  ;;  %v145_v12 = vld [vmem:[%s688_s2 + $0x20] sm:$0xff]  ;;  %v30_v13 = vld [vmem:[%s687_s1 + $0x38] sm:$0xff]  ;;  %417 = vmatprep.subr.bf16.mxu0 %v509_v15  ;;  %v511_v34 = vmov 0.0   ;;  %s512_s10 = smov [#allocation3]  }
   0xe   :  { %174 = vperm.xlu1 %447, %v144_v7   ;;  %v29_v14 = vld [vmem:[%s687_s1 + $0x30] sm:$0xff]  ;;  %v148_v16 = vld [vmem:[%s688_s2 + $0x38] sm:$0xff]  ;;  %v32_v18 = vld [vmem:[%s687_s1 + $0x48] sm:$0xff]  ;;  %414 = vmatprep.mubr.msk.f32.mxu0 %vm510_vm0, %v511_v34  ;;  %s355_s11 = sshll.u32 %s512_s10, 4  ;;  %s356_s11 = int_to_ptr.vmem [resolvable:$true] %s355_s11 }
   0xf   :  { %169 = vperm.xlu0 %446, %v143_v8   ;;  %v147_v17 = vld [vmem:[%s688_s2 + $0x30] sm:$0xff]  ;;  %v31_v19 = vld [vmem:[%s687_s1 + $0x40] sm:$0xff]  ;;  %v150_v20 = vld [vmem:[%s688_s2 + $0x48] sm:$0xff]  ;;  %s484_s12 = scalar_lea.vmem %s356_s11, 16  ;;  %p489_p1 = scmp.lt.s32.totalorder %s356_s11, %s356_s11 }
  0x10   :  { %v149_v21 = vld [vmem:[%s688_s2 + $0x40] sm:$0xff]  ;;  %v34_v22 = vld [vmem:[%s687_s1 + $0x58] sm:$0xff]  ;;  %v33_v23 = vld [vmem:[%s687_s1 + $0x50] sm:$0xff]  ;;  %p485_p0 = scmp.ne.s32.totalorder %s356_s11, %s484_s12 }
  0x11   :  { %v152_v24 = vld [vmem:[%s688_s2 + $0x58] sm:$0xff]  ;;  %v151_v25 = vld [vmem:[%s688_s2 + $0x50] sm:$0xff]  ;;  %v36_v26 = vld [vmem:[%s687_s1 + $0x68] sm:$0xff] }
  0x12   :  { %66 = vperm.xlu1 %447, %v28_v9   ;;  %v35_v27 = vld [vmem:[%s687_s1 + $0x60] sm:$0xff]  ;;  %v154_v28 = vld [vmem:[%s688_s2 + $0x68] sm:$0xff]  ;;  %v38_v30 = vld [vmem:[%s687_s1 + $0x78] sm:$0xff] }
  0x13   :  { %61 = vperm.xlu0 %446, %v27_v10   ;;  %v153_v29 = vld [vmem:[%s688_s2 + $0x60] sm:$0xff]  ;;  %v37_v31 = vld [vmem:[%s687_s1 + $0x70] sm:$0xff]  ;;  %v156_v32 = vld [vmem:[%s688_s2 + $0x78] sm:$0xff] }
  0x14   :  { %v155_v33 = vld [vmem:[%s688_s2 + $0x70] sm:$0xff]  ;;  %v643_v35 = vld [vmem:[%s686_s0] ss:$0 sm:$0xff] }
  0x16   :  { %184 = vperm.xlu1 %447, %v146_v11  }
  0x17   :  { %179 = vperm.xlu0 %446, %v145_v12  }
  0x1a   :  { %76 = vperm.xlu1 %447, %v30_v13  }
  0x1b   :  { %71 = vperm.xlu0 %446, %v29_v14  }
  0x1e   :  { %194 = vperm.xlu1 %447, %v148_v16  }
  0x1f   :  { %189 = vperm.xlu0 %446, %v147_v17  }
  0x22   :  { %86 = vperm.xlu1 %447, %v32_v18  }
  0x23   :  { %81 = vperm.xlu0 %446, %v31_v19  }
  0x26   :  { %204 = vperm.xlu1 %447, %v150_v20  }
  0x27   :  { %199 = vperm.xlu0 %446, %v149_v21  }
  0x2a   :  { %96 = vperm.xlu1 %447, %v34_v22  }
  0x2b   :  { %91 = vperm.xlu0 %446, %v33_v23  }
  0x2e   :  { %214 = vperm.xlu1 %447, %v152_v24  }
  0x2f   :  { %209 = vperm.xlu0 %446, %v151_v25  }
  0x32   :  { %106 = vperm.xlu1 %447, %v36_v26  }
  0x33   :  { %101 = vperm.xlu0 %446, %v35_v27  }
  0x36   :  { %224 = vperm.xlu1 %447, %v154_v28  }
  0x37   :  { %219 = vperm.xlu0 %446, %v153_v29  }
  0x3a   :  { %116 = vperm.xlu1 %447, %v38_v30  }
  0x3b   :  { %111 = vperm.xlu0 %446, %v37_v31  }
  0x3e   :  { %234 = vperm.xlu1 %447, %v156_v32  }
  0x3f   :  { %229 = vperm.xlu0 %446, %v155_v33  }
  0x81   :  { %v160_v36 = vpop.permute.xlu1 %159 }
  0x82   :  { %v42_v37 = vpop.permute.xlu0 %41 }
  0x83   :  { %v125_v38 = vmul.f32 %v643_v35, %v42_v37 }
  0x85   :  { %v237_v39 = vadd.f32 %v160_v36, %v125_v38  ;;  %v165_v40 = vpop.permute.xlu1 %164 }
  0x86   :  { %v47_v41 = vpop.permute.xlu0 %46 }
  0x87   :  { %v126_v42 = vmul.f32 %v643_v35, %v47_v41  ;;  %448 = vtanh.f32 %v237_v39 }
  0x89   :  { %v238_v43 = vadd.f32 %v165_v40, %v126_v42  ;;  %v57_v44 = vpop.permute.xlu1 %56 }
  0x8a   :  { %v52_v45 = vpop.permute.xlu0 %51  ;;  %v128_v46 = vmul.f32 %v643_v35, %v57_v44 }
  0x8b   :  { %450 = vtanh.f32 %v238_v43  ;;  %v127_v47 = vmul.f32 %v643_v35, %v52_v45 }
  0x8d   :  { %v175_v48 = vpop.permute.xlu1 %174 }
  0x8e   :  { %v170_v49 = vpop.permute.xlu0 %169  ;;  %v240_v50 = vadd.f32 %v175_v48, %v128_v46 }
  0x8f   :  { %v239_v51 = vadd.f32 %v170_v49, %v127_v47 }
  0x90   :  { %452 = vtanh.f32 %v240_v50 }
  0x91   :  { %454 = vtanh.f32 %v239_v51  ;;  %v67_v52 = vpop.permute.xlu1 %66  ;;  %v449_v54 = vpop.eup %448 }
  0x92   :  { %v62_v53 = vpop.permute.xlu0 %61  ;;  %v130_v56 = vmul.f32 %v643_v35, %v67_v52 }
  0x93   :  { %v129_v57 = vmul.f32 %v643_v35, %v62_v53 }
  0x95   :  { %v451_v55 = vpop.eup %450  ;;  %v185_v58 = vpop.permute.xlu1 %184 }
  0x96   :  { %v180_v59 = vpop.permute.xlu0 %179  ;;  %v418_v60 = vpack.c.bf16 %v451_v55, %v449_v54  ;;  %v242_v61 = vadd.f32 %v185_v58, %v130_v56 }
  0x97   :  { %v241_v62 = vadd.f32 %v180_v59, %v129_v57 }
  0x98   :  { %419 = vmatpush3.bf16.msra.mxu0 %v418_v60  ;;  %456 = vtanh.f32 %v242_v61 }
  0x99   :  { %420 = vmatprep.subr.bf16.mxu0 %v509_v15  ;;  %458 = vtanh.f32 %v241_v62  ;;  %v77_v63 = vpop.permute.xlu1 %76  ;;  %v271_v62 = vstv %s690_s4 }
  0x9a   :  { %v72_v0 = vpop.permute.xlu0 %71  ;;  %v453_v1 = vpop.eup %452  ;;  %v132_v3 = vmul.f32 %v643_v35, %v77_v63 }
  0x9b   :  { %v455_v2 = vpop.eup %454  ;;  %v131_v4 = vmul.f32 %v643_v35, %v72_v0 }
  0x9c   :  { %v421_v5 = vpack.c.bf16 %v453_v1, %v455_v2 }
  0x9d   :  { %v195_v6 = vpop.permute.xlu1 %194 }
  0x9e   :  { %v190_v7 = vpop.permute.xlu0 %189  ;;  %v244_v8 = vadd.f32 %v195_v6, %v132_v3  ;;  %422 = vmatpush3.bf16.msra.mxu0 %v421_v5 }
  0x9f   :  { %v243_v9 = vadd.f32 %v190_v7, %v131_v4  ;;  %423 = vmatprep.subr.bf16.mxu0 %v509_v15 }
  0xa0   :  { %460 = vtanh.f32 %v244_v8 }
  0xa1   :  { %462 = vtanh.f32 %v243_v9  ;;  %v87_v10 = vpop.permute.xlu1 %86 }
  0xa2   :  { %v82_v11 = vpop.permute.xlu0 %81  ;;  %v457_v12 = vpop.eup %456  ;;  %v134_v14 = vmul.f32 %v643_v35, %v87_v10 }
  0xa3   :  { %v459_v13 = vpop.eup %458  ;;  %v133_v16 = vmul.f32 %v643_v35, %v82_v11 }
  0xa4   :  { %v424_v17 = vpack.c.bf16 %v457_v12, %v459_v13 }
  0xa5   :  { %v205_v18 = vpop.permute.xlu1 %204 }
  0xa6   :  { %v200_v19 = vpop.permute.xlu0 %199  ;;  %v246_v20 = vadd.f32 %v205_v18, %v134_v14  ;;  %425 = vmatpush3.bf16.msra.mxu0 %v424_v17 }
  0xa7   :  { %v245_v21 = vadd.f32 %v200_v19, %v133_v16  ;;  %426 = vmatprep.subr.bf16.mxu0 %v509_v15 }
  0xa8   :  { %464 = vtanh.f32 %v246_v20 }
  0xa9   :  { %466 = vtanh.f32 %v245_v21  ;;  %v97_v22 = vpop.permute.xlu1 %96 }
  0xaa   :  { %v92_v23 = vpop.permute.xlu0 %91  ;;  %v461_v24 = vpop.eup %460  ;;  %v136_v26 = vmul.f32 %v643_v35, %v97_v22 }
  0xab   :  { %v463_v25 = vpop.eup %462  ;;  %v135_v27 = vmul.f32 %v643_v35, %v92_v23 }
  0xac   :  { %v427_v28 = vpack.c.bf16 %v461_v24, %v463_v25 }
  0xad   :  { %v215_v29 = vpop.permute.xlu1 %214 }
  0xae   :  { %v210_v30 = vpop.permute.xlu0 %209  ;;  %v248_v31 = vadd.f32 %v215_v29, %v136_v26  ;;  %428 = vmatpush3.bf16.msra.mxu0 %v427_v28 }
  0xaf   :  { %v247_v32 = vadd.f32 %v210_v30, %v135_v27  ;;  %429 = vmatprep.subr.bf16.mxu0 %v509_v15 }
  0xb0   :  { %468 = vtanh.f32 %v248_v31 }
  0xb1   :  { %470 = vtanh.f32 %v247_v32  ;;  %v107_v33 = vpop.permute.xlu1 %106 }
  0xb2   :  { %v102_v34 = vpop.permute.xlu0 %101  ;;  %v465_v36 = vpop.eup %464  ;;  %v138_v38 = vmul.f32 %v643_v35, %v107_v33 }
  0xb3   :  { %v467_v37 = vpop.eup %466  ;;  %v137_v39 = vmul.f32 %v643_v35, %v102_v34 }
  0xb4   :  { %v430_v40 = vpack.c.bf16 %v465_v36, %v467_v37 }
  0xb5   :  { %v225_v41 = vpop.permute.xlu1 %224 }
  0xb6   :  { %v220_v42 = vpop.permute.xlu0 %219  ;;  %v250_v43 = vadd.f32 %v225_v41, %v138_v38  ;;  %431 = vmatpush3.bf16.msra.mxu0 %v430_v40 }
  0xb7   :  { %v249_v44 = vadd.f32 %v220_v42, %v137_v39  ;;  %432 = vmatprep.subr.bf16.mxu0 %v509_v15 }
  0xb8   :  { %472 = vtanh.f32 %v250_v43 }
  0xb9   :  { %474 = vtanh.f32 %v249_v44  ;;  %v117_v45 = vpop.permute.xlu1 %116 }
  0xba   :  { %v112_v46 = vpop.permute.xlu0 %111  ;;  %v469_v47 = vpop.eup %468  ;;  %v140_v49 = vmul.f32 %v643_v35, %v117_v45 }
  0xbb   :  { %v471_v48 = vpop.eup %470  ;;  %v139_v50 = vmul.f32 %v643_v35, %v112_v46  ;;  %v269_v35 = vld [vmem:[%s689_s3] sm:$0x1]  ;;  %s488_s3 = scalar_lea.vmem %s356_s11, 32 }
  0xbc   :  { %v433_v51 = vpack.c.bf16 %v469_v47, %v471_v48  ;;  %p490_p2 = scmp.lt.s32.totalorder %s488_s3, %s484_s12 }
  0xbd   :  { %v235_v52 = vpop.permute.xlu1 %234 }
  0xbe   :  { %v230_v53 = vpop.permute.xlu0 %229  ;;  %v252_v54 = vadd.f32 %v235_v52, %v140_v49  ;;  %434 = vmatpush3.bf16.msra.mxu0 %v433_v51  ;;  %p491_p3 = por %p490_p2, %p489_p1 }
  0xbf   :  { %v251_v55 = vadd.f32 %v230_v53, %v139_v50  ;;  %435 = vmatprep.subr.bf16.mxu0 %v509_v15 }
  0xc0   :  { %476 = vtanh.f32 %v252_v54  ;;  %p492_p4 = pnand %p491_p3, %p485_p0 }
  0xc1   :  { %478 = vtanh.f32 %v251_v55 }
  0xc2   :  { %v473_v56 = vpop.eup %472 }
  0xc3   :  { %v475_v57 = vpop.eup %474 }
  0xc4   :  { %v436_v58 = vpack.c.bf16 %v473_v56, %v475_v57 }
  0xc6   :  { %437 = vmatpush3.bf16.msra.mxu0 %v436_v58 }
  0xc7   :  { %438 = vmatprep.subr.bf16.mxu0 %v509_v15 }
  0xca   :  { %v477_v59 = vpop.eup %476 }
  0xcb   :  { %v479_v60 = vpop.eup %478 }
  0xcc   :  { %v439_v61 = vpack.c.bf16 %v477_v59, %v479_v60 }
  0xce   :  { %440 = vmatpush3.bf16.msra.mxu0 %v439_v61 }
  0xd1   :  { %415 = vmatmul.mubr.f32.vlgmr.msra.gmra.mrb[0].mxu0 %v269_v35 }
 0x1a4   :  { %v338_v63 = vpop.f32.mrb[0].mxu0 }
 0x1a5   :  { %v339_v0 = vadd.f32 %v338_v63, %v271_v62  ;;  %v416_v1 = vpop.f32.mrb[1].mxu0 }
 0x1a7   :  { %v364_v2 = vmul.f32 -1.442695, %v339_v0 }
 0x1a9   :  { %480 = vpow2.f32 %v364_v2 }
 0x1b3   :  { %v481_v3 = vpop.eup %480 }
 0x1b4   :  { %v345_v15 = vadd.f32 1.0, %v481_v3 }
 0x1b6   :  { %482 = vrcp.f32 %v345_v15 }
 0x1c0   :  { %v483_v4 = vpop.eup %482 }
 0x1c1   :  { %348 = vst [vmem:[#allocation3] sm:$0x1] %v483_v4 }
 0x1c2   :  { %495 = shalt.err (!%p492_p4)
}
 0x1c3   :  { %s496_s14 = scalar_lea.hbm %s691_s5, 16 }
 0x1c4   :  { %p497_p5 = scmp.ne.s32.totalorder %s691_s5, %s496_s14  ;;  %p500_p6 = scmp.lt.u32.totalorder %s496_s14, %s691_s5 }
 0x1c6   :  { %p502_p7 = pnand %p500_p6, %p497_p5 }
 0x1c8   :  { %505 = shalt.err (!%p502_p7)
}
 0x1c9   :  { %358 = dma.vmem_to_hbm [thread:$0]  %s356_s11, 16, %s691_s5, [#allocation4]  }
 0x1ca   :  { %506 = dma.done.wait [#allocation4], 16  }
 0x1cb   :  { %507 = vsyncadd [#allocation4], 4294967280 }
 0x1cc   :  { %362 = vsyncpa [#allocation4], 1 }

</bundles_post_ra>
